<compile_context>
chip_gen: v5e
topology: v5e:2x2
jax: 0.10.0
libtpu: 0.0.40
codegen_flags: <defaults>
</compile_context>

<pallas_src>
import jax
import jax.numpy as jnp
from jax.experimental import pallas as pl
from jax.experimental.pallas import tpu as pltpu


def _round_up(x: int, m: int) -> int:
    return (x + m - 1) // m * m


def _spec(shape, index_map, bufs=None):
    """BlockSpec with optional explicit buffer count."""
    if bufs is None:
        return pl.BlockSpec(shape, index_map)
    return pl.BlockSpec(shape, index_map, pipeline_mode=pl.Buffered(bufs))


def mlp_kernel(x_ref, w1_ref, b1_ref, w2_ref, b2_ref, out_ref):
    # x_ref:   (TM, D_pad)      f32/bf16  batch tile of flattened input
    # w1_ref:  (D_pad, H_pad)   bf16      fc1 weight, pre-transposed (in, out)
    # b1_ref:  (1, H_pad)       f32
    # w2_ref:  (H_pad, C_pad)   bf16      fc2 weight, pre-transposed (in, out)
    # b2_ref:  (1, C_pad)       f32
    # out_ref: (TM, C_pad)      f32       padded logits
    x = x_ref[...].astype(jnp.bfloat16)          # cast in-kernel (no extra HBM pass)

    # fc1: canonical MK x KN contraction, f32 accumulation on the MXU.
    h = jnp.dot(x, w1_ref[...], preferred_element_type=jnp.float32)
    h = jax.nn.sigmoid(h + b1_ref[...])          # bias + sigmoid in f32 (EUP)

    # fc2: bf16 operands, f32 accumulation.
    out = jnp.dot(h.astype(jnp.bfloat16), w2_ref[...],
                  preferred_element_type=jnp.float32)
    out_ref[...] = (out + b2_ref[...]).astype(out_ref.dtype)


def two_layer_net(x, w1, b1, w2, b2):
    """Forward pass of TwoLayerNet.

    x:  (N, ...)              flattened to (N, input_dim)
    w1: (hidden, input_dim)   PyTorch nn.Linear layout
    b1: (hidden,)
    w2: (num_classes, hidden)
    b2: (num_classes,)
    returns (N, num_classes) float32 logits
    """
    n = x.shape[0]
    x2d = x.reshape(n, -1)
    d = x2d.shape[1]
    h = w1.shape[0]
    c = w2.shape[0]

    # Lane-/sublane-friendly padded sizes.
    d_pad = _round_up(d, 128)
    h_pad = _round_up(h, 128)
    c_pad = _round_up(c, 128)

    # Keep x in f32 (or bf16 if it already is); the kernel casts to bf16.
    x2d = x2d if x2d.dtype == jnp.bfloat16 else x2d.astype(jnp.float32)
    x_bytes = jnp.dtype(x2d.dtype).itemsize

    # Per-generation VMEM budget (v7x: 64 MiB/TC physical; v5e/v6e: 128 MiB).
    try:
        phys_vmem = int(pltpu.get_tpu_info().vmem_capacity_bytes)
    except Exception:
        phys_vmem = 64 * 1024 * 1024
    budget = min(phys_vmem // 2, 100 * 1024 * 1024)

    # Resident weights/biases: single-buffer them only when it actually saves
    # meaningful VMEM (constant index_map => no next-block prefetch needed).
    weight_bytes = (d_pad * h_pad + h_pad * c_pad) * 2 + (h_pad + c_pad) * 4
    w_bufs = 1 if weight_bytes >= (4 * 1024 * 1024) else None
    resident_bytes = weight_bytes * (w_bufs or 2)

    def fits(tm, x_bufs):
        per_step = x_bufs * tm * d_pad * x_bytes + 2 * tm * c_pad * 4
        return resident_bytes + per_step <= budget

    # Batch tile: cap at 512, force >=2 grid steps when n > 8 (v7x megacore),
    # bound padding waste, and fit the VMEM budget.
    tm_cap = 512
    if n > 8:
        tm_cap = min(tm_cap, _round_up(pl.cdiv(n, 2), 8))
    tm = 8
    for cand in (512, 256, 128, 64, 32, 16, 8):
        if cand > tm_cap:
            continue
        waste = _round_up(n, cand) - n
        if waste > max(n // 8, 8):          # bound batch-padding waste
            continue
        if not fits(cand, 2):
            continue
        tm = cand
        break
    while tm > 8 and not fits(tm, 2):
        tm //= 2
    n_pad = _round_up(n, tm)
    num_steps = n_pad // tm

    # Deeper x pipelining only pays off with several grid steps (v5e/v6e
    # HBM-bound case); keep the default double-buffer otherwise.
    x_bufs = 3 if (num_steps >= 3 and fits(tm, 3)) else None

    # One-time wrapper-side transforms (fused by XLA into the cast/pad):
    # pre-transpose weights so the kernel does MK x KN with no in-kernel
    # transpose; zero-pad to lane-dense shapes; biases stay f32.
    if n_pad != n or d_pad != d:
        x_in = jnp.pad(x2d, ((0, n_pad - n), (0, d_pad - d)))
    else:
        x_in = x2d
    w1_t = jnp.pad(w1.T.astype(jnp.bfloat16), ((0, d_pad - d), (0, h_pad - h)))
    w2_t = jnp.pad(w2.T.astype(jnp.bfloat16), ((0, h_pad - h), (0, c_pad - c)))
    b1_p = jnp.pad(b1.astype(jnp.float32), (0, h_pad - h)).reshape(1, h_pad)
    b2_p = jnp.pad(b2.astype(jnp.float32), (0, c_pad - c)).reshape(1, c_pad)

    # VMEM limit: actual footprint + headroom, capped below physical.
    need = ((x_bufs or 2) * tm * d_pad * x_bytes
            + 2 * tm * c_pad * 4
            + resident_bytes)
    vmem_limit = min(max(32 * 1024 * 1024, int(1.25 * need) + (2 << 20)),
                     phys_vmem - (8 << 20))

    cost = pl.CostEstimate(
        flops=2 * n_pad * d_pad * h_pad + 2 * n_pad * h_pad * c_pad,
        transcendentals=n_pad * h_pad,
        bytes_accessed=(n_pad * d_pad * x_bytes
                        + (d_pad * h_pad + h_pad * c_pad) * 2
                        + (h_pad + c_pad) * 4
                        + n_pad * c_pad * 4),
    )

    out_padded = pl.pallas_call(
        mlp_kernel,
        out_shape=jax.ShapeDtypeStruct((n_pad, c_pad), jnp.float32),
        grid=(num_steps,),
        in_specs=[
            _spec((tm, d_pad), lambda i: (i, 0), x_bufs),     # x: tiled over batch
            _spec((d_pad, h_pad), lambda i: (0, 0), w_bufs),  # w1^T: resident
            _spec((1, h_pad), lambda i: (0, 0), w_bufs),      # b1:   resident
            _spec((h_pad, c_pad), lambda i: (0, 0), w_bufs),  # w2^T: resident
            _spec((1, c_pad), lambda i: (0, 0), w_bufs),      # b2:   resident
        ],
        out_specs=pl.BlockSpec((tm, c_pad), lambda i: (i, 0)),
        compiler_params=pltpu.CompilerParams(
            dimension_semantics=("parallel",),
            vmem_limit_bytes=vmem_limit,
        ),
        cost_estimate=cost,
    )(x_in, w1_t, b1_p, w2_t, b2_p)

    # Slice padded logits back to the real (N, num_classes).
    return out_padded[:n, :c]


if __name__ == "__main__":
    # Shapes consistent with the module: NCHW input (2, 4, 16, 16)
    # -> input_dim = 4*16*16 = 1024, hidden_size = 32, num_classes = 10.
    N, C_in, H_sp, W_sp = 2, 4, 16, 16
    input_dim = C_in * H_sp * W_sp
    hidden_size = 32
    num_classes = 10

    key = jax.random.PRNGKey(0)
    kx, kw1, kb1, kw2, kb2 = jax.random.split(key, 5)

    x = jax.random.normal(kx, (N, C_in, H_sp, W_sp), dtype=jnp.float32)

    # Deterministic synthetic parameter init (uniform, like torch's default
    # kaiming-uniform-ish range) — not a checkpoint load.
    bound1 = 1.0 / (input_dim ** 0.5)
    w1 = jax.random.uniform(kw1, (hidden_size, input_dim), jnp.float32,
                            -bound1, bound1)
    b1 = jax.random.uniform(kb1, (hidden_size,), jnp.float32, -bound1, bound1)
    bound2 = 1.0 / (hidden_size ** 0.5)
    w2 = jax.random.uniform(kw2, (num_classes, hidden_size), jnp.float32,
                            -bound2, bound2)
    b2 = jax.random.uniform(kb2, (num_classes,), jnp.float32, -bound2, bound2)

    out = two_layer_net(x, w1, b1, w2, b2)
    out = jax.block_until_ready(out)

    # Reference check in plain JAX using the same bf16-quantized operands the
    # kernel consumes (accumulation/bias/sigmoid math in f32, as in-kernel).
    x2d = x.reshape(N, -1)
    xq = x2d.astype(jnp.bfloat16).astype(jnp.float32)
    w1q = w1.astype(jnp.bfloat16).astype(jnp.float32)
    w2q = w2.astype(jnp.bfloat16).astype(jnp.float32)
    hq = jax.nn.sigmoid(xq @ w1q.T + b1)
    ref = hq.astype(jnp.bfloat16).astype(jnp.float32) @ w2q.T + b2

    assert out.shape == (N, num_classes)
    assert jnp.allclose(out, ref, atol=1e-2, rtol=1e-2), (
        float(jnp.max(jnp.abs(out - ref))))

    print("KERNEL_OK")
</pallas_src>

<mosaic_0001>
module attributes {stable_mosaic.version = 11 : i64} {
  func.func @mlp_kernel(%arg0: i32, %arg1: memref<8x1024xf32, #tpu.memory_space<vmem>>, %arg2: memref<1024x128xbf16, #tpu.memory_space<vmem>>, %arg3: memref<1x128xf32, #tpu.memory_space<vmem>>, %arg4: memref<128x128xbf16, #tpu.memory_space<vmem>>, %arg5: memref<1x128xf32, #tpu.memory_space<vmem>>, %arg6: memref<8x128xf32, #tpu.memory_space<vmem>>) attributes {dimension_semantics = [#tpu.dimension_semantics<parallel>], iteration_bounds = array<i64: 1>, scalar_prefetch = 0 : i64, scratch_operands = 0 : i64, tpu.core_type = #tpu.core_type<tc>, window_params = [{transform_indices = @transform_0, window_bounds = array<i64: 8, 1024>}, {pipeline_mode = #tpu.pipeline_mode<synchronous>, transform_indices = @transform_1, window_bounds = array<i64: 1024, 128>}, {pipeline_mode = #tpu.pipeline_mode<synchronous>, transform_indices = @transform_2, window_bounds = array<i64: 1, 128>}, {pipeline_mode = #tpu.pipeline_mode<synchronous>, transform_indices = @transform_3, window_bounds = array<i64: 128, 128>}, {pipeline_mode = #tpu.pipeline_mode<synchronous>, transform_indices = @transform_4, window_bounds = array<i64: 1, 128>}, {transform_indices = @transform_5, window_bounds = array<i64: 8, 128>}]} {
    %c0 = arith.constant 0 : index
    %c0_0 = arith.constant 0 : index
    %0 = vector.load %arg1[%c0, %c0_0] : memref<8x1024xf32, #tpu.memory_space<vmem>>, vector<8x1024xf32>
    %1 = arith.truncf %0 : vector<8x1024xf32> to vector<8x1024xbf16>
    %c0_1 = arith.constant 0 : index
    %c0_2 = arith.constant 0 : index
    %2 = vector.load %arg2[%c0_1, %c0_2] : memref<1024x128xbf16, #tpu.memory_space<vmem>>, vector<1024x128xbf16>
    %cst = arith.constant dense<0.000000e+00> : vector<8x128xf32>
    %3 = tpu.matmul %1, %2, %cst {dimension_numbers = #tpu.dot_dimension_numbers<[1], [0], [0], [1], [0, 0, 1, 1], [], []>} : vector<8x1024xbf16>, vector<1024x128xbf16>, vector<8x128xf32> -> vector<8x128xf32>
    %c0_3 = arith.constant 0 : index
    %c0_4 = arith.constant 0 : index
    %4 = vector.load %arg3[%c0_3, %c0_4] : memref<1x128xf32, #tpu.memory_space<vmem>>, vector<1x128xf32>
    %5 = vector.broadcast %4 : vector<1x128xf32> to vector<8x128xf32>
    %6 = arith.addf %3, %5 : vector<8x128xf32>
    %7 = arith.negf %6 : vector<8x128xf32>
    %8 = math.exp %7 : vector<8x128xf32>
    %cst_5 = arith.constant 1.000000e+00 : f32
    %9 = vector.broadcast %cst_5 : f32 to vector<8x128xf32>
    %10 = arith.addf %9, %8 : vector<8x128xf32>
    %11 = arith.divf %9, %10 : vector<8x128xf32>
    %12 = arith.truncf %11 : vector<8x128xf32> to vector<8x128xbf16>
    %c0_6 = arith.constant 0 : index
    %c0_7 = arith.constant 0 : index
    %13 = vector.load %arg4[%c0_6, %c0_7] : memref<128x128xbf16, #tpu.memory_space<vmem>>, vector<128x128xbf16>
    %cst_8 = arith.constant dense<0.000000e+00> : vector<8x128xf32>
    %14 = tpu.matmul %12, %13, %cst_8 {dimension_numbers = #tpu.dot_dimension_numbers<[1], [0], [0], [1], [0, 0, 1, 1], [], []>} : vector<8x128xbf16>, vector<128x128xbf16>, vector<8x128xf32> -> vector<8x128xf32>
    %c0_9 = arith.constant 0 : index
    %c0_10 = arith.constant 0 : index
    %15 = vector.load %arg5[%c0_9, %c0_10] : memref<1x128xf32, #tpu.memory_space<vmem>>, vector<1x128xf32>
    %16 = vector.broadcast %15 : vector<1x128xf32> to vector<8x128xf32>
    %17 = arith.addf %14, %16 : vector<8x128xf32>
    %c0_11 = arith.constant 0 : index
    %c0_12 = arith.constant 0 : index
    %18 = vector.load %arg6[%c0_11, %c0_12] : memref<8x128xf32, #tpu.memory_space<vmem>>, vector<8x128xf32>
    tpu.vector_store %arg6[%c0_11, %c0_12], %17 {strides = array<i32>} : memref<8x128xf32, #tpu.memory_space<vmem>>, vector<8x128xf32>,
    return
  }
  func.func @transform_0(%arg0: i32) -> (i32, i32) {
    %c0_i32 = arith.constant 0 : i32
    %c0_i32_0 = arith.constant 0 : i32
    return %arg0, %c0_i32 : i32, i32
  }
  func.func @transform_1(%arg0: i32) -> (i32, i32) {
    %c0_i32 = arith.constant 0 : i32
    %c0_i32_0 = arith.constant 0 : i32
    %c0_i32_1 = arith.constant 0 : i32
    return %c0_i32, %c0_i32_0 : i32, i32
  }
  func.func @transform_2(%arg0: i32) -> (i32, i32) {
    %c0_i32 = arith.constant 0 : i32
    %c0_i32_0 = arith.constant 0 : i32
    %c0_i32_1 = arith.constant 0 : i32
    return %c0_i32, %c0_i32_0 : i32, i32
  }
  func.func @transform_3(%arg0: i32) -> (i32, i32) {
    %c0_i32 = arith.constant 0 : i32
    %c0_i32_0 = arith.constant 0 : i32
    %c0_i32_1 = arith.constant 0 : i32
    return %c0_i32, %c0_i32_0 : i32, i32
  }
  func.func @transform_4(%arg0: i32) -> (i32, i32) {
    %c0_i32 = arith.constant 0 : i32
    %c0_i32_0 = arith.constant 0 : i32
    %c0_i32_1 = arith.constant 0 : i32
    return %c0_i32, %c0_i32_0 : i32, i32
  }
  func.func @transform_5(%arg0: i32) -> (i32, i32) {
    %c0_i32 = arith.constant 0 : i32
    %c0_i32_0 = arith.constant 0 : i32
    return %arg0, %c0_i32 : i32, i32
  }
}

</mosaic_0001>

<bundles_post_ra>
// kernel: tpu_custom_call.1
= control target key start
LH: loop header
LB: loop body
LE: loop exit
PB: predicated region body
PF: predicated region fallthrough
CT: control target
= control target key end

     0   :  { %10 = vsyncpa [#allocation3], 0  ;;  %s1351_s0 = inlined_call_operand.hbm [shape: f32[8,1024], index: 0, kind: input, shape index: {}]   ;;  %s1352_s1 = inlined_call_operand.hbm [shape: bf16[1024,128], index: 1, kind: input, shape index: {}]   ;;  %s1353_s2 = inlined_call_operand.vmem [shape: f32[1,128], index: 2, kind: input, shape index: {}]   ;;  %s1354_s3 = inlined_call_operand.hbm [shape: bf16[128,128], index: 3, kind: input, shape index: {}]   ;;  %s1355_s4 = inlined_call_operand.vmem [shape: f32[1,128], index: 4, kind: input, shape index: {}]   ;;  %s1356_s5 = inlined_call_operand.hbm [shape: f32[8,128], index: 5, kind: output, shape index: {}]  }
   0x1   :  { %11 = vsyncpa [#allocation6], 0  ;;  %s28_s20 = sshll.u32 %s1352_s1, 4  ;;  %s29_s20 = int_to_ptr.hbm [resolvable:$true] %s28_s20 }
   0x2   :  { %12 = vsyncpa [#allocation4], 0  ;;  %s1297_s21 = smov [#allocation5]   ;;  %s18_s25 = sshll.u32 %s1351_s0, 4  ;;  %s19_s25 = int_to_ptr.hbm [resolvable:$true] %s18_s25 }
   0x3   :  { %s30_s22 = sshll.u32 %s1297_s21, 4  ;;  %s1298_s26 = smov 64   ;;  %s31_s22 = int_to_ptr.vmem [resolvable:$true] %s30_s22 }
   0x4   :  { %s1299_s27 = smov 4   ;;  %s1300_s28 = smov [#allocation2]  }
   0x5   :  { %36 = dma.hbm_to_vmem [thread:$0]  %s29_s20, 8192, %s31_s22, [#allocation6], %s1298_s26, %s1298_s26, %s1299_s27  }
   0x6   :  { %s20_s29 = sshll.u32 %s1300_s28, 4  ;;  %s43_s7 = sshll.u32 %s1354_s3, 4  ;;  %s21_s29 = int_to_ptr.vmem [resolvable:$true] %s20_s29  ;;  %s44_s7 = int_to_ptr.hbm [resolvable:$true] %s43_s7 }
   0x7   :  { %23 = dma.hbm_to_vmem [thread:$0]  %s19_s25, 1024, %s21_s29, [#allocation3]  }
   0x8   :  { %s1301_s1 = smov [#allocation7]  }
   0x9   :  { %s45_s8 = sshll.u32 %s1301_s1, 4  ;;  %s46_s8 = int_to_ptr.vmem [resolvable:$true] %s45_s8 }
   0xa   :  { %51 = dma.hbm_to_vmem [thread:$0]  %s44_s7, 1024, %s46_s8, [#allocation6], %s1298_s26, %s1298_s26, %s1299_s27  }
   0xb   :  { %1291 = dma.done.wait [#allocation3], 1024  }
   0xc   :  { %1292 = vsyncadd [#allocation3], 4294966272 }
   0xd   :  { %1293 = dma.done.wait [#allocation6], 9216  }
   0xe   :  { %1294 = vsyncadd [#allocation6], 4294958080  ;;  %v1118_v0 = vld [vmem:[#allocation5 + $0x38] sm:$0xff]  ;;  %v1117_v4 = vld [vmem:[#allocation5 + $0x30] sm:$0xff]  ;;  %s1302_s10 = smov [#allocation8]   ;;  %s811_s14 = sshll.u32 %s1356_s5, 4  ;;  %s812_s14 = int_to_ptr.hbm [resolvable:$true] %s811_s14 }
   0xf   :  { %v1126_v1 = vld [vmem:[#allocation5 + $0x78] sm:$0xff]  ;;  %598 = vmatpush.bf16.msra.mxu0 %v1118_v0  ;;  %v1125_v5 = vld [vmem:[#allocation5 + $0x70] sm:$0xff]  ;;  %v1116_v8 = vld [vmem:[#allocation5 + $0x28] sm:$0xff]  ;;  %s809_s11 = sshll.u32 %s1302_s10, 4  ;;  %s810_s11 = int_to_ptr.vmem [resolvable:$true] %s809_s11 }
  0x10   :  { %v1134_v2 = vld [vmem:[#allocation5 + $0xb8] sm:$0xff]  ;;  %611 = vmatpush.bf16.msra.mxu1 %v1126_v1  ;;  %v1133_v6 = vld [vmem:[#allocation5 + $0xb0] sm:$0xff]  ;;  %v1124_v9 = vld [vmem:[#allocation5 + $0x68] sm:$0xff] }
  0x11   :  { %v1142_v3 = vld [vmem:[#allocation5 + $0xf8] sm:$0xff]  ;;  %624 = vmatpush.bf16.msra.mxu2 %v1134_v2  ;;  %v1141_v7 = vld [vmem:[#allocation5 + $0xf0] sm:$0xff]  ;;  %v1132_v10 = vld [vmem:[#allocation5 + $0xa8] sm:$0xff] }
  0x12   :  { %637 = vmatpush.bf16.msra.mxu3 %v1142_v3  ;;  %v1140_v11 = vld [vmem:[#allocation5 + $0xe8] sm:$0xff]  ;;  %v1115_v12 = vld [vmem:[#allocation5 + $0x20] sm:$0xff]  ;;  %v1114_v16 = vld [vmem:[#allocation5 + $0x18] sm:$0xff] }
  0x13   :  { %599 = vmatpush.bf16.msra.mxu0 %v1117_v4  ;;  %v1123_v13 = vld [vmem:[#allocation5 + $0x60] sm:$0xff]  ;;  %v1122_v17 = vld [vmem:[#allocation5 + $0x58] sm:$0xff]  ;;  %v1113_v20 = vld [vmem:[#allocation5 + $0x10] sm:$0xff] }
  0x14   :  { %612 = vmatpush.bf16.msra.mxu1 %v1125_v5  ;;  %v1131_v14 = vld [vmem:[#allocation5 + $0xa0] sm:$0xff]  ;;  %v1130_v18 = vld [vmem:[#allocation5 + $0x98] sm:$0xff]  ;;  %v1121_v21 = vld [vmem:[#allocation5 + $0x50] sm:$0xff] }
  0x15   :  { %625 = vmatpush.bf16.msra.mxu2 %v1133_v6  ;;  %v1139_v15 = vld [vmem:[#allocation5 + $0xe0] sm:$0xff]  ;;  %v1138_v19 = vld [vmem:[#allocation5 + $0xd8] sm:$0xff]  ;;  %v1129_v22 = vld [vmem:[#allocation5 + $0x90] sm:$0xff] }
  0x16   :  { %638 = vmatpush.bf16.msra.mxu3 %v1141_v7  ;;  %v1137_v23 = vld [vmem:[#allocation5 + $0xd0] sm:$0xff]  ;;  %v1112_v24 = vld [vmem:[#allocation5 + $0x8] sm:$0xff]  ;;  %v1111_v28 = vld [vmem:[#allocation5] sm:$0xff] }
  0x17   :  { %600 = vmatpush.bf16.msra.mxu0 %v1116_v8  ;;  %v1120_v25 = vld [vmem:[#allocation5 + $0x48] sm:$0xff]  ;;  %v1119_v29 = vld [vmem:[#allocation5 + $0x40] sm:$0xff]  ;;  %v1150_v32 = vld [vmem:[#allocation5 + $0x138] sm:$0xff] }
  0x18   :  { %613 = vmatpush.bf16.msra.mxu1 %v1124_v9  ;;  %v1128_v26 = vld [vmem:[#allocation5 + $0x88] sm:$0xff]  ;;  %v1127_v30 = vld [vmem:[#allocation5 + $0x80] sm:$0xff]  ;;  %v68_v33 = vld [vmem:[#allocation2 + $0x10] sm:$0xff] }
  0x19   :  { %626 = vmatpush.bf16.msra.mxu2 %v1132_v10  ;;  %v1136_v27 = vld [vmem:[#allocation5 + $0xc8] sm:$0xff]  ;;  %v1135_v31 = vld [vmem:[#allocation5 + $0xc0] sm:$0xff]  ;;  %v1158_v35 = vld [vmem:[#allocation5 + $0x178] sm:$0xff]  ;;  %v76_v40 = vpack.c.bf16 %v68_v33, %v68_v33 }
  0x1a   :  { %639 = vmatpush.bf16.msra.mxu3 %v1140_v11  ;;  %v66_v34 = vld [vmem:[#allocation2] sm:$0xff]  ;;  %v69_v36 = vld [vmem:[#allocation2 + $0x18] sm:$0xff]  ;;  %v67_v37 = vld [vmem:[#allocation2 + $0x8] sm:$0xff] }
  0x1b   :  { %601 = vmatpush.bf16.msra.mxu0 %v1115_v12  ;;  %v1166_v38 = vld [vmem:[#allocation5 + $0x1b8] sm:$0xff]  ;;  %v74_v41 = vpack.c.bf16 %v66_v34, %v66_v34  ;;  %v77_v42 = vpack.c.bf16 %v69_v36, %v69_v36  ;;  %v75_v43 = vpack.c.bf16 %v67_v37, %v67_v37  ;;  %v1149_v44 = vld [vmem:[#allocation5 + $0x130] sm:$0xff]  ;;  %v1148_v48 = vld [vmem:[#allocation5 + $0x128] sm:$0xff] }
  0x1c   :  { %614 = vmatpush.bf16.msra.mxu1 %v1123_v13  ;;  %v1174_v39 = vld [vmem:[#allocation5 + $0x1f8] sm:$0xff]  ;;  %v1157_v45 = vld [vmem:[#allocation5 + $0x170] sm:$0xff]  ;;  %v1156_v49 = vld [vmem:[#allocation5 + $0x168] sm:$0xff] }
  0x1d   :  { %627 = vmatpush.bf16.msra.mxu2 %v1131_v14  ;;  %v1165_v46 = vld [vmem:[#allocation5 + $0x1b0] sm:$0xff]  ;;  %v1164_v50 = vld [vmem:[#allocation5 + $0x1a8] sm:$0xff]  ;;  %v1147_v52 = vld [vmem:[#allocation5 + $0x120] sm:$0xff] }
  0x1e   :  { %640 = vmatpush.bf16.msra.mxu3 %v1139_v15  ;;  %v1173_v47 = vld [vmem:[#allocation5 + $0x1f0] sm:$0xff]  ;;  %v1172_v51 = vld [vmem:[#allocation5 + $0x1e8] sm:$0xff]  ;;  %v1155_v53 = vld [vmem:[#allocation5 + $0x160] sm:$0xff] }
  0x1f   :  { %602 = vmatpush.bf16.msra.mxu0 %v1114_v16  ;;  %v1163_v54 = vld [vmem:[#allocation5 + $0x1a0] sm:$0xff]  ;;  %v1146_v56 = vld [vmem:[#allocation5 + $0x118] sm:$0xff]  ;;  %v1145_v60 = vld [vmem:[#allocation5 + $0x110] sm:$0xff] }
  0x20   :  { %615 = vmatpush.bf16.msra.mxu1 %v1122_v17  ;;  %v1171_v55 = vld [vmem:[#allocation5 + $0x1e0] sm:$0xff]  ;;  %v1154_v57 = vld [vmem:[#allocation5 + $0x158] sm:$0xff]  ;;  %v1153_v61 = vld [vmem:[#allocation5 + $0x150] sm:$0xff] }
  0x21   :  { %628 = vmatpush.bf16.msra.mxu2 %v1130_v18  ;;  %v1162_v58 = vld [vmem:[#allocation5 + $0x198] sm:$0xff]  ;;  %v1161_v62 = vld [vmem:[#allocation5 + $0x190] sm:$0xff]  ;;  %v1144_v0 = vld [vmem:[#allocation5 + $0x108] sm:$0xff] }
  0x22   :  { %641 = vmatpush.bf16.msra.mxu3 %v1138_v19  ;;  %v1170_v59 = vld [vmem:[#allocation5 + $0x1d8] sm:$0xff]  ;;  %v1169_v63 = vld [vmem:[#allocation5 + $0x1d0] sm:$0xff]  ;;  %v1152_v1 = vld [vmem:[#allocation5 + $0x148] sm:$0xff] }
  0x23   :  { %603 = vmatpush.bf16.msra.mxu0 %v1113_v20  ;;  %v1160_v2 = vld [vmem:[#allocation5 + $0x188] sm:$0xff]  ;;  %v1143_v4 = vld [vmem:[#allocation5 + $0x100] sm:$0xff]  ;;  %v72_v10 = vld [vmem:[#allocation2 + $0x30] sm:$0xff] }
  0x24   :  { %616 = vmatpush.bf16.msra.mxu1 %v1121_v21  ;;  %v1168_v3 = vld [vmem:[#allocation5 + $0x1c8] sm:$0xff]  ;;  %v1151_v5 = vld [vmem:[#allocation5 + $0x140] sm:$0xff]  ;;  %v73_v11 = vld [vmem:[#allocation2 + $0x38] sm:$0xff]  ;;  %v80_v14 = vpack.c.bf16 %v72_v10, %v72_v10 }
  0x25   :  { %629 = vmatpush.bf16.msra.mxu2 %v1129_v22  ;;  %v1159_v6 = vld [vmem:[#allocation5 + $0x180] sm:$0xff]  ;;  %v71_v8 = vld [vmem:[#allocation2 + $0x28] sm:$0xff]  ;;  %v81_v15 = vpack.c.bf16 %v73_v11, %v73_v11  ;;  %v1182_v19 = vld [vmem:[#allocation7 + $0x38] sm:$0xff] }
  0x26   :  { %642 = vmatpush.bf16.msra.mxu3 %v1137_v23  ;;  %v70_v7 = vld [vmem:[#allocation2 + $0x20] sm:$0xff]  ;;  %v79_v13 = vpack.c.bf16 %v71_v8, %v71_v8  ;;  %v1181_v23 = vld [vmem:[#allocation7 + $0x30] sm:$0xff]  ;;  %v1176_v37 = vld [vmem:[#allocation7 + $0x8] sm:$0xff] }
  0x27   :  { %604 = vmatpush.bf16.msra.mxu0 %v1112_v24  ;;  %v1167_v9 = vld [vmem:[#allocation5 + $0x1c0] sm:$0xff]  ;;  %v78_v12 = vpack.c.bf16 %v70_v7, %v70_v7  ;;  %v1177_v33 = vld [vmem:[#allocation7 + $0x10] sm:$0xff] }
  0x28   :  { %617 = vmatpush.bf16.msra.mxu1 %v1120_v25  ;;  %v1189_v24 = vld [vmem:[%s1353_s2] ss:$0 sm:$0xff] }
  0x29   :  { %630 = vmatpush.bf16.msra.mxu2 %v1128_v26  ;;  %v1180_v26 = vld [vmem:[#allocation7 + $0x28] sm:$0xff] }
  0x2a   :  { %643 = vmatpush.bf16.msra.mxu3 %v1136_v27 }
  0x2b   :  { %605 = vmatpush.bf16.msra.mxu0 %v1111_v28 }
  0x2c   :  { %618 = vmatpush.bf16.msra.mxu1 %v1119_v29  ;;  %v1179_v29 = vld [vmem:[#allocation7 + $0x20] sm:$0xff] }
  0x2d   :  { %631 = vmatpush.bf16.msra.mxu2 %v1127_v30 }
  0x2e   :  { %644 = vmatpush.bf16.msra.mxu3 %v1135_v31  ;;  %606 = vmatmul.bf16.vlgmr.msra.gmra.mxu0 %v74_v41  ;;  %v1178_v31 = vld [vmem:[#allocation7 + $0x18] sm:$0xff] }
  0x2f   :  { %650 = vmatpush.bf16.msrb.mxu0 %v1150_v32  ;;  %619 = vmatmul.bf16.vlgmr.msra.gmra.mxu1 %v75_v43 }
  0x30   :  { %663 = vmatpush.bf16.msrb.mxu1 %v1158_v35  ;;  %632 = vmatmul.bf16.vlgmr.msra.gmra.mxu2 %v76_v40 }
  0x31   :  { %676 = vmatpush.bf16.msrb.mxu2 %v1166_v38  ;;  %645 = vmatmul.bf16.vlgmr.msra.gmra.mxu3 %v77_v42 }
  0x32   :  { %689 = vmatpush.bf16.msrb.mxu3 %v1174_v39  ;;  %v1175_v39 = vld [vmem:[#allocation7] sm:$0xff] }
  0x33   :  { %651 = vmatpush.bf16.msrb.mxu0 %v1149_v44 }
  0x34   :  { %664 = vmatpush.bf16.msrb.mxu1 %v1157_v45 }
  0x35   :  { %677 = vmatpush.bf16.msrb.mxu2 %v1165_v46 }
  0x36   :  { %690 = vmatpush.bf16.msrb.mxu3 %v1173_v47 }
  0x37   :  { %652 = vmatpush.bf16.msrb.mxu0 %v1148_v48 }
  0x38   :  { %665 = vmatpush.bf16.msrb.mxu1 %v1156_v49 }
  0x39   :  { %678 = vmatpush.bf16.msrb.mxu2 %v1164_v50 }
  0x3a   :  { %691 = vmatpush.bf16.msrb.mxu3 %v1172_v51 }
  0x3b   :  { %653 = vmatpush.bf16.msrb.mxu0 %v1147_v52 }
  0x3c   :  { %666 = vmatpush.bf16.msrb.mxu1 %v1155_v53 }
  0x3d   :  { %679 = vmatpush.bf16.msrb.mxu2 %v1163_v54 }
  0x3e   :  { %692 = vmatpush.bf16.msrb.mxu3 %v1171_v55 }
  0x3f   :  { %654 = vmatpush.bf16.msrb.mxu0 %v1146_v56 }
  0x40   :  { %667 = vmatpush.bf16.msrb.mxu1 %v1154_v57 }
  0x41   :  { %680 = vmatpush.bf16.msrb.mxu2 %v1162_v58 }
  0x42   :  { %693 = vmatpush.bf16.msrb.mxu3 %v1170_v59 }
  0x43   :  { %655 = vmatpush.bf16.msrb.mxu0 %v1145_v60 }
  0x44   :  { %668 = vmatpush.bf16.msrb.mxu1 %v1153_v61 }
  0x45   :  { %681 = vmatpush.bf16.msrb.mxu2 %v1161_v62 }
  0x46   :  { %694 = vmatpush.bf16.msrb.mxu3 %v1169_v63  ;;  %v1190_v63 = vld [vmem:[%s1355_s4] ss:$0 sm:$0xff] }
  0x47   :  { %656 = vmatpush.bf16.msrb.mxu0 %v1144_v0 }
  0x48   :  { %669 = vmatpush.bf16.msrb.mxu1 %v1152_v1 }
  0x49   :  { %682 = vmatpush.bf16.msrb.mxu2 %v1160_v2 }
  0x4a   :  { %695 = vmatpush.bf16.msrb.mxu3 %v1168_v3 }
  0x4b   :  { %657 = vmatpush.bf16.msrb.mxu0 %v1143_v4 }
  0x4c   :  { %670 = vmatpush.bf16.msrb.mxu1 %v1151_v5 }
  0x4d   :  { %683 = vmatpush.bf16.msrb.mxu2 %v1159_v6 }
  0x4e   :  { %696 = vmatpush.bf16.msrb.mxu3 %v1167_v9  ;;  %658 = vmatmul.bf16.vlgmr.msrb.gmra.mxu0 %v78_v12 }
  0x4f   :  { %671 = vmatmul.bf16.vlgmr.msrb.gmra.mxu1 %v79_v13  ;;  %790 = vmatpush.bf16.msra.mxu0 %v1182_v19 }
  0x50   :  { %684 = vmatmul.bf16.vlgmr.msrb.gmra.mxu2 %v80_v14 }
  0x51   :  { %697 = vmatmul.bf16.vlgmr.msrb.gmra.mxu3 %v81_v15 }
  0x53   :  { %791 = vmatpush.bf16.msra.mxu0 %v1181_v23 }
  0x57   :  { %792 = vmatpush.bf16.msra.mxu0 %v1180_v26 }
  0x5b   :  { %793 = vmatpush.bf16.msra.mxu0 %v1179_v29 }
  0x5f   :  { %794 = vmatpush.bf16.msra.mxu0 %v1178_v31 }
  0x63   :  { %795 = vmatpush.bf16.msra.mxu0 %v1177_v33 }
  0x67   :  { %796 = vmatpush.bf16.msra.mxu0 %v1176_v37 }
  0x6b   :  { %797 = vmatpush.bf16.msra.mxu0 %v1175_v39 }
  0xab   :  { %v607_v16 = vpop.f32.mrf.mxu0 }
  0xac   :  { %v620_v17 = vpop.f32.mrf.mxu1  ;;  %v608_v28 = vadd.f32 %v1189_v24, %v607_v16 }
  0xae   :  { %v621_v30 = vadd.f32 %v620_v17, %v608_v28 }
  0xb3   :  { %v633_v18 = vpop.f32.mrf.mxu2  ;;  %v609_v21 = vpop.f32.mrf.mxu0 }
  0xb4   :  { %v646_v20 = vpop.f32.mrf.mxu3  ;;  %v622_v22 = vpop.f32.mrf.mxu1  ;;  %v634_v32 = vadd.f32 %v633_v18, %v621_v30 }
  0xb6   :  { %v647_v34 = vadd.f32 %v646_v20, %v634_v32 }
  0xbb   :  { %v635_v25 = vpop.f32.mrf.mxu2 }
  0xbc   :  { %v648_v27 = vpop.f32.mrf.mxu3 }
  0xcb   :  { %v659_v35 = vpop.f32.mrf.mxu0 }
  0xcc   :  { %v672_v36 = vpop.f32.mrf.mxu1  ;;  %v660_v38 = vadd.f32 %v659_v35, %v647_v34 }
  0xce   :  { %v673_v40 = vadd.f32 %v672_v36, %v660_v38 }
  0xd3   :  { %v685_v41 = vpop.f32.mrf.mxu2  ;;  %v661_v44 = vpop.f32.mrf.mxu0 }
  0xd4   :  { %v698_v42 = vpop.f32.mrf.mxu3  ;;  %v686_v43 = vadd.f32 %v685_v41, %v673_v40  ;;  %v674_v45 = vpop.f32.mrf.mxu1 }
  0xd6   :  { %v699_v46 = vadd.f32 %v698_v42, %v686_v43 }
  0xd8   :  { %v1078_v47 = vmul.f32 -1.442695, %v699_v46 }
  0xda   :  { %1191 = vpow2.f32 %v1078_v47 }
  0xdb   :  { %v687_v48 = vpop.f32.mrf.mxu2 }
  0xdc   :  { %v700_v49 = vpop.f32.mrf.mxu3 }
  0xe0   :  { %v1192_v50 = vpop.eup %1191 }
  0xe1   :  { %v705_v51 = vadd.f32 1.0, %v1192_v50 }
  0xe3   :  { %1193 = vrcp.f32 %v705_v51  ;;  %v717_v55 = vand.u32 2147483648, %v705_v51  ;;  %v715_v57 = vand.u32 2147483647, %v705_v51  ;;  %vm711_vm1 = vweird.f32 %v705_v51 }
  0xe5   :  { %v718_v59 = vor.u32 1.1754944e-38, %v717_v55  ;;  %vm716_vm3 = vcmp.eq.f32.partialorder %v715_v57, 8.507059e+37 }
  0xe9   :  { %v1194_v52 = vpop.eup %1193 }
  0xea   :  { %v707_v53 = vmul.f32 %v1194_v52, %v705_v51  ;;  %vm712_vm0 = vweird.f32 %v1194_v52 }
  0xeb   :  { %vm713_vm2 = vmor %vm711_vm1, %vm712_vm0 }
  0xec   :  { %v708_v54 = vsub.f32 1.0, %v707_v53 }
  0xee   :  { %v709_v56 = vmul.f32 %v1194_v52, %v708_v54 }
  0xf0   :  { %v710_v58 = vadd.f32 %v1194_v52, %v709_v56 }
  0xf2   :  { %v714_v60 = vsel %vm713_vm2, %v1194_v52, %v710_v58 }
  0xf3   :  { %v719_v61 = vsel %vm716_vm3, %v718_v59, %v714_v60 }
  0xf4   :  { %v721_v62 = vpack.c.bf16 %v719_v61, %v719_v61 }
  0xf6   :  { %798 = vmatmul.bf16.vlgmr.msra.gmra.mxu0 %v721_v62 }
 0x173   :  { %v799_v0 = vpop.f32.mrf.mxu0 }
 0x174   :  { %v800_v1 = vadd.f32 %v1190_v63, %v799_v0 }
 0x176   :  { %803 = vst [vmem:[#allocation8] sm:$0xff] %v800_v1 }
 0x177   :  { %814 = dma.vmem_to_hbm [thread:$0]  %s810_s11, 128, %s812_s14, [#allocation4]  }
 0x17b   :  { %v801_v2 = vpop.f32.mrf.mxu0 }
 0x17c   :  { %1295 = dma.done.wait [#allocation4], 128  }
 0x17d   :  { %1296 = vsyncadd [#allocation4], 4294967168 }
 0x17e   :  { %819 = vsyncpa [#allocation3], 1 }
 0x17f   :  { %820 = vsyncpa [#allocation6], 1 }
 0x180   :  { %821 = vsyncpa [#allocation4], 1 }

</bundles_post_ra>
